<compile_context>
chip_gen: v5e
topology: v5e:2x2
jax: 0.10.0
libtpu: 0.0.40
codegen_flags: <defaults>
</compile_context>

<pallas_src>
import functools

import jax
import jax.numpy as jnp
from jax import lax
from jax.experimental import pallas as pl
from jax.experimental.pallas import tpu as pltpu


_INV_SQRT2 = 0.7071067811865476


# --------------------------------------------------------------------------
# exact (erf) GELU, matching nn.GELU() default.  A&S 7.1.26 erf polynomial.
# EUP handles the reciprocal (approx) and the exp; on v6e/v7x the polynomial
# itself is evaluated in bf16 (bf16 VPU), on v5e it stays f32.
# --------------------------------------------------------------------------
def _gelu_erf(h, *, low_precision):
    z = h * _INV_SQRT2                                    # f32
    az = jnp.abs(z)
    t32 = pl.reciprocal(1.0 + 0.3275911 * az, approx=True)   # EUP slot
    cd = jnp.bfloat16 if low_precision else jnp.float32
    t = t32.astype(cd)
    a1, a2, a3, a4, a5 = (0.254829592, -0.284496736, 1.421413741,
                          -1.453152027, 1.061405429)
    poly = t * (a1 + t * (a2 + t * (a3 + t * (a4 + t * a5))))
    e = jnp.exp(-(az * az))                               # EUP slot, f32
    erf_abs = 1.0 - poly.astype(jnp.float32) * e
    erf = jnp.where(z >= 0.0, erf_abs, -erf_abs)
    return 0.5 * h * (1.0 + erf)


# --------------------------------------------------------------------------
# Phase 1: routing kernel (router linear + top-k mask + softmax), all f32.
# --------------------------------------------------------------------------
def _routing_kernel(*refs, num_experts, top_k, has_emotion):
    if has_emotion:
        x_ref, eb_ref, wr_ref, br_ref, rw_ref = refs
    else:
        x_ref, wr_ref, br_ref, rw_ref = refs
        eb_ref = None

    logits = (jnp.dot(x_ref[...], wr_ref[...],
                      preferred_element_type=jnp.float32) + br_ref[...])
    if has_emotion:
        logits = logits + eb_ref[...]

    if top_k < num_experts:
        # threshold = k-th largest logit per row (ties kept, identical to the
        # reference's sort + ">= threshold").  O(E^2) unrolled compare-rank;
        # fine for the small E typical of MoE routers.
        neg_inf = jnp.float32(-jnp.inf)
        thr = jnp.full((logits.shape[0], 1), -jnp.inf, jnp.float32)
        for j in range(num_experts):
            v = logits[:, j:j + 1]
            cnt = jnp.sum(jnp.where(logits >= v, 1.0, 0.0),
                          axis=-1, keepdims=True)
            thr = jnp.maximum(thr, jnp.where(cnt >= top_k, v, neg_inf))
        logits = jnp.where(logits >= thr, logits, neg_inf)

    m = jnp.max(logits, axis=-1, keepdims=True)
    p = jnp.exp(logits - m)                   # masked experts -> exactly 0.0
    rw_ref[...] = p * pl.reciprocal(jnp.sum(p, axis=-1, keepdims=True),
                                    approx=True)


# --------------------------------------------------------------------------
# Phase 2: expert kernel.  Grid step (t, hb, j): token tile t, hidden block
# hb, expert *slot* j (slot -> expert id via the scalar-prefetched schedule).
# --------------------------------------------------------------------------
def _expert_kernel(sched_ref, count_ref, x_ref, rw_ref, w1_ref, b1_ref,
                   w2_ref, b2_ref, o_ref, *, num_experts, low_precision_gelu):
    t = pl.program_id(0)
    hb = pl.program_id(1)
    j = pl.program_id(2)

    # output tile is resident across (hb, j); zero it on the first visit and
    # accumulate directly into it (no separate f32 scratch accumulator).
    @pl.when(jnp.logical_and(hb == 0, j == 0))
    def _zero():
        o_ref[...] = jnp.zeros_like(o_ref)

    # skip padded expert slots (their weight DMA is already elided because
    # the schedule repeats the previous block index for them).
    @pl.when(j < count_ref[t])
    def _compute():
        e_id = sched_ref[t * num_experts + j]

        xb = x_ref[...]                                        # [TN, D] bf16
        h = (jnp.dot(xb, w1_ref[0], preferred_element_type=jnp.float32)
             + b1_ref[0])                                      # [TN, HB] f32
        h = _gelu_erf(h, low_precision=low_precision_gelu)
        y = jnp.dot(h.astype(jnp.bfloat16), w2_ref[0],
                    preferred_element_type=jnp.float32)        # [TN, D] f32
        # b2 is added once per expert (first H block only).
        y = y + b2_ref[0] * jnp.where(hb == 0, 1.0, 0.0)

        # routing weight of the scheduled expert: one-hot select over lanes.
        rw = rw_ref[...]                                       # [TN, E] f32
        col = lax.broadcasted_iota(jnp.int32, rw.shape, 1)
        w_e = jnp.sum(jnp.where(col == e_id, rw, 0.0), axis=-1, keepdims=True)

        o_ref[...] += y * w_e


# --------------------------------------------------------------------------
# helpers
# --------------------------------------------------------------------------
def _tpu_generation():
    try:
        kind = jax.devices()[0].device_kind.lower()
    except Exception:
        return 0
    for g in (7, 6, 5, 4, 3):
        if "v" + str(g) in kind:
            return g
    return 0


def _ceil_to(x, m):
    return ((x + m - 1) // m) * m


def _pick_hidden_block(H, cap=2048):
    """Largest multiple-of-128 divisor of H that is <= cap (else full H)."""
    best = 0
    d = 128
    while d <= min(H, cap):
        if H % d == 0:
            best = d
        d += 128
    return best if best > 0 else H


def prepare_moe_params(params):
    """One-time parameter prep: pre-cast expert weights to bf16 MXU operands
    so the HBM-heavy cast is never repeated per forward call."""
    wr, br, w1, b1, w2, b2, wer, ber = params
    # TODO(synk): on v7x, optionally quantize W1/W2 to fp8 (+ per-channel
    #             scales) to halve weight HBM bytes / VMEM footprint again.
    return (wr.astype(jnp.float32), br.astype(jnp.float32),
            w1.astype(jnp.bfloat16), b1.astype(jnp.float32),
            w2.astype(jnp.bfloat16), b2.astype(jnp.float32),
            None if wer is None else wer.astype(jnp.float32),
            None if ber is None else ber.astype(jnp.float32))


# --------------------------------------------------------------------------
# wrapper
# --------------------------------------------------------------------------
def moe_forward(x, prepared_params, *, sparse_top_k, emotion_weights=None):
    """x: [B, S, D] float32 -> [B, S, D] float32.
    `prepared_params` should come from prepare_moe_params(...)."""
    wr, br, w1_b, b1, w2_b, b2, wer, ber = prepared_params
    if w1_b.dtype != jnp.bfloat16:       # prefer prepare_moe_params() (one-time)
        w1_b = w1_b.astype(jnp.bfloat16)
    if w2_b.dtype != jnp.bfloat16:
        w2_b = w2_b.astype(jnp.bfloat16)

    B, S, D = x.shape
    N = B * S
    E = wr.shape[1]
    H = w1_b.shape[2]
    has_emotion = emotion_weights is not None and wer is not None

    # ---- generation-aware tile sizes & VMEM budgets -----------------------
    gen = _tpu_generation()
    if gen >= 7:
        tn_target, vmem_cap = 512, 56 << 20      # headroom below 64 MiB physical
    elif gen == 6:
        tn_target, vmem_cap = 512, 100 << 20
    elif gen == 5:
        tn_target, vmem_cap = 256, 96 << 20
    else:
        tn_target, vmem_cap = 256, 56 << 20
    low_precision_gelu = gen >= 6                # bf16 VPU on v6e/v7x only

    TN = tn_target if N >= tn_target else max(16, _ceil_to(N, 16))
    HB = _pick_hidden_block(H)

    def vmem_need(tn, hbk):
        return (2 * tn * D * 2            # x tile (bf16, double-buffered)
                + 2 * tn * E * 4          # routing-weight tile (f32)
                + 2 * 2 * D * hbk * 2     # W1 + W2 slabs (bf16, double-buffered)
                + 2 * (hbk + D) * 4       # per-expert bias slabs
                + 2 * tn * D * 4          # resident output tile (f32)
                + tn * hbk * 4            # live GELU activation
                + tn * D * 4)             # live partial y

    # shrink H block first (it frees VMEM better spent on TN), then TN.
    while (vmem_need(TN, HB) > vmem_cap // 2 and HB > 512 and HB % 256 == 0
           and H % (HB // 2) == 0):
        HB //= 2
    while vmem_need(TN, HB) > vmem_cap // 2 and TN > 128:
        TN //= 2

    N_pad = _ceil_to(N, TN)
    T = N_pad // TN
    n_hb = H // HB if H % HB == 0 else 1
    if H % HB != 0:
        HB = H

    x_f32 = x.reshape(N, D).astype(jnp.float32)
    if N_pad != N:
        x_f32 = jnp.pad(x_f32, ((0, N_pad - N), (0, 0)))
    x_b16 = x_f32.astype(jnp.bfloat16)   # expert-matmul stream (router keeps f32)

    # ---- Phase 1: routing weights (f32 Pallas kernel) ----------------------
    r_inputs = [x_f32]
    r_specs = [pl.BlockSpec((TN, D), lambda i: (i, 0))]
    if has_emotion:
        eb = (jnp.dot(emotion_weights.astype(jnp.float32), wer,
                      precision=lax.Precision.HIGHEST) + ber)          # [B, E]
        eb = jnp.broadcast_to(eb[:, None, :], (B, S, E)).reshape(N, E)
        if N_pad != N:
            eb = jnp.pad(eb, ((0, N_pad - N), (0, 0)))
        r_inputs.append(eb)
        r_specs.append(pl.BlockSpec((TN, E), lambda i: (i, 0)))
    r_inputs += [wr, br]
    r_specs += [pl.BlockSpec((D, E), lambda i: (0, 0)),
                pl.BlockSpec((1, E), lambda i: (0, 0))]

    routing_vmem = int(1.5 * (2 * TN * D * 4 + 4 * TN * E * 4
                              + 2 * (D * E + E) * 4)) + (8 << 20)
    rw = pl.pallas_call(
        functools.partial(_routing_kernel, num_experts=E, top_k=sparse_top_k,
                          has_emotion=has_emotion),
        out_shape=jax.ShapeDtypeStruct((N_pad, E), jnp.float32),
        grid_spec=pltpu.PrefetchScalarGridSpec(
            num_scalar_prefetch=0, grid=(T,),
            in_specs=r_specs,
            out_specs=pl.BlockSpec((TN, E), lambda i: (i, 0))),
        compiler_params=pltpu.CompilerParams(
            dimension_semantics=("parallel",),
            vmem_limit_bytes=int(min(max(routing_vmem, 32 << 20), vmem_cap))),
    )(*r_inputs)

    # ---- glue: per-tile expert schedule (drives the scalar-prefetch maps) --
    if N_pad != N:
        rw = jnp.where(jnp.arange(N_pad, dtype=jnp.int32)[:, None] < N, rw, 0.0)

    active = jnp.any(rw.reshape(T, TN, E) > 0.0, axis=1)                 # [T, E]
    count = jnp.sum(active.astype(jnp.int32), axis=1).astype(jnp.int32)  # [T]
    order = jnp.argsort(jnp.logical_not(active).astype(jnp.int32),
                        axis=1, stable=True).astype(jnp.int32)           # [T, E]
    last_e = jnp.take_along_axis(order, jnp.maximum(count - 1, 0)[:, None],
                                 axis=1)
    slot = jnp.arange(E, dtype=jnp.int32)[None, :]
    # padded slots repeat the last active expert -> no new weight DMA.
    sched = jnp.where(slot < count[:, None], order, last_e)              # [T, E]
    sched_flat = sched.reshape(-1)

    # ---- Phase 2: expert MLPs with DMA-level expert skipping ---------------
    e_specs = [
        pl.BlockSpec((TN, D), lambda t, h, j, s, c: (t, 0)),        # x (bf16)
        pl.BlockSpec((TN, E), lambda t, h, j, s, c: (t, 0)),        # rw (f32)
        pl.BlockSpec((1, D, HB),
                     lambda t, h, j, s, c: (s[t * E + j], 0, h)),   # W1 slab
        pl.BlockSpec((1, 1, HB),
                     lambda t, h, j, s, c: (s[t * E + j], 0, h)),   # b1 slab
        pl.BlockSpec((1, HB, D),
                     lambda t, h, j, s, c: (s[t * E + j], h, 0)),   # W2 slab
        pl.BlockSpec((1, 1, D),
                     lambda t, h, j, s, c: (s[t * E + j], 0, 0)),   # b2
    ]
    # TODO(synk): add pipeline_mode=pl.Buffered(3) on the W1/W2 specs on
    #             v5e/v6e only if an xprof trace shows exposed DMA latency.

    vmem_limit = int(min(max(int(vmem_need(TN, HB) * 1.5) + (8 << 20),
                             32 << 20), vmem_cap))

    out = pl.pallas_call(
        functools.partial(_expert_kernel, num_experts=E,
                          low_precision_gelu=low_precision_gelu),
        out_shape=jax.ShapeDtypeStruct((N_pad, D), jnp.float32),
        grid_spec=pltpu.PrefetchScalarGridSpec(
            num_scalar_prefetch=2,
            grid=(T, n_hb, E),
            in_specs=e_specs,
            out_specs=pl.BlockSpec((TN, D), lambda t, h, j, s, c: (t, 0))),
        compiler_params=pltpu.CompilerParams(
            dimension_semantics=("parallel", "arbitrary", "arbitrary"),
            vmem_limit_bytes=vmem_limit),
    )(sched_flat, count, x_b16, rw, w1_b, b1, w2_b, b2)

    return out[:N].reshape(B, S, D).astype(x.dtype)


# --------------------------------------------------------------------------
# deterministic parameter init (mimics nn.Linear's U(-1/sqrt(fan_in), ...))
# --------------------------------------------------------------------------
def init_params(key, input_dim, num_experts, hidden_dim, emotional_dim=4,
                emotional_routing=False):
    ks = jax.random.split(key, 10)

    def lin(k, fan_in, fan_out):
        bound = 1.0 / jnp.sqrt(fan_in)
        kw, kb = jax.random.split(k)
        w = jax.random.uniform(kw, (fan_in, fan_out), jnp.float32, -bound, bound)
        b = jax.random.uniform(kb, (fan_out,), jnp.float32, -bound, bound)
        return w, b

    wr, br = lin(ks[0], input_dim, num_experts)
    br = br.reshape(1, num_experts)

    w1s, b1s, w2s, b2s = [], [], [], []
    for e in range(num_experts):
        w1, b1 = lin(ks[1 + e], input_dim, hidden_dim)
        w2, b2 = lin(ks[1 + num_experts + e], hidden_dim, input_dim)
        w1s.append(w1); b1s.append(b1.reshape(1, hidden_dim))
        w2s.append(w2); b2s.append(b2.reshape(1, input_dim))
    w1 = jnp.stack(w1s); b1 = jnp.stack(b1s)
    w2 = jnp.stack(w2s); b2 = jnp.stack(b2s)

    if emotional_routing:
        wer, ber = lin(ks[9], emotional_dim, num_experts)
    else:
        wer, ber = None, None
    return (wr, br, w1, b1, w2, b2, wer, ber)


# --------------------------------------------------------------------------
# pure-JAX reference (f32, highest matmul precision)
# --------------------------------------------------------------------------
def moe_reference(x, params, *, sparse_top_k, emotion_weights=None):
    wr, br, w1, b1, w2, b2, wer, ber = params
    B, S, D = x.shape
    E = wr.shape[1]
    hi = lax.Precision.HIGHEST
    xf = x.reshape(-1, D)
    logits = jnp.dot(xf, wr, precision=hi) + br
    if emotion_weights is not None and wer is not None:
        eb = jnp.dot(emotion_weights, wer, precision=hi) + ber
        logits = logits + jnp.broadcast_to(eb[:, None, :], (B, S, E)).reshape(-1, E)
    if sparse_top_k < E:
        srt = jnp.sort(logits, axis=-1)[:, ::-1]
        thr = srt[:, sparse_top_k - 1:sparse_top_k]
        logits = jnp.where(logits >= thr, logits, -jnp.inf)
    rw = jax.nn.softmax(logits, axis=-1)
    out = jnp.zeros_like(xf)
    for e in range(E):
        h = jax.nn.gelu(jnp.dot(xf, w1[e], precision=hi) + b1[e],
                        approximate=False)
        y = jnp.dot(h, w2[e], precision=hi) + b2[e]
        out = out + y * rw[:, e:e + 1]
    return out.reshape(B, S, D)


if __name__ == "__main__":
    B, S, D = 2, 8, 32           # batch, seq_len, input_dim
    E, TOPK = 4, 2               # num_experts, sparse_top_k
    H = 4 * D                    # hidden_dim (module default input_dim * 4)

    key = jax.random.PRNGKey(0)
    kx, kp = jax.random.split(key)
    x = jax.random.normal(kx, (B, S, D), jnp.float32)

    # default path (emotional_routing=False, the module default)
    params = init_params(kp, D, E, H)
    prepared = prepare_moe_params(params)     # one-time bf16 weight cast
    out = jax.block_until_ready(moe_forward(x, prepared, sparse_top_k=TOPK))
    ref = moe_reference(x, params, sparse_top_k=TOPK)
    assert out.shape == (B, S, D)
    # tolerance covers bf16 MXU operands and (on v6e/v7x) the bf16 GELU poly
    assert jnp.allclose(out, ref, rtol=2.5e-2, atol=2.5e-2), \
        float(jnp.max(jnp.abs(out - ref)))

    # emotional-routing path
    params_e = init_params(kp, D, E, H, emotional_routing=True)
    prepared_e = prepare_moe_params(params_e)
    ew = jax.random.normal(jax.random.fold_in(key, 7), (B, 4), jnp.float32)
    out_e = jax.block_until_ready(
        moe_forward(x, prepared_e, sparse_top_k=TOPK, emotion_weights=ew))
    ref_e = moe_reference(x, params_e, sparse_top_k=TOPK, emotion_weights=ew)
    assert out_e.shape == (B, S, D)
    assert jnp.allclose(out_e, ref_e, rtol=2.5e-2, atol=2.5e-2), \
        float(jnp.max(jnp.abs(out_e - ref_e)))

    print("KERNEL_OK")
</pallas_src>

<mosaic_0001>
module attributes {stable_mosaic.version = 11 : i64} {
  func.func @_routing_kernel(%arg0: i32, %arg1: memref<16x32xf32, #tpu.memory_space<vmem>>, %arg2: memref<32x4xf32, #tpu.memory_space<vmem>>, %arg3: memref<1x4xf32, #tpu.memory_space<vmem>>, %arg4: memref<16x4xf32, #tpu.memory_space<vmem>>) attributes {dimension_semantics = [#tpu.dimension_semantics<parallel>], iteration_bounds = array<i64: 1>, scalar_prefetch = 0 : i64, scratch_operands = 0 : i64, tpu.core_type = #tpu.core_type<tc>, window_params = [{transform_indices = @transform_0, window_bounds = array<i64: 16, 32>}, {pipeline_mode = #tpu.pipeline_mode<synchronous>, transform_indices = @transform_1, window_bounds = array<i64: 32, 4>}, {pipeline_mode = #tpu.pipeline_mode<synchronous>, transform_indices = @transform_2, window_bounds = array<i64: 1, 4>}, {transform_indices = @transform_3, window_bounds = array<i64: 16, 4>}]} {
    %c0 = arith.constant 0 : index
    %c0_0 = arith.constant 0 : index
    %0 = vector.load %arg1[%c0, %c0_0] : memref<16x32xf32, #tpu.memory_space<vmem>>, vector<16x32xf32>
    %c0_1 = arith.constant 0 : index
    %c0_2 = arith.constant 0 : index
    %1 = vector.load %arg2[%c0_1, %c0_2] : memref<32x4xf32, #tpu.memory_space<vmem>>, vector<32x4xf32>
    %cst = arith.constant dense<0.000000e+00> : vector<16x4xf32>
    %2 = tpu.matmul %0, %1, %cst {dimension_numbers = #tpu.dot_dimension_numbers<[1], [0], [0], [1], [0, 0, 1, 1], [], []>} : vector<16x32xf32>, vector<32x4xf32>, vector<16x4xf32> -> vector<16x4xf32>
    %c0_3 = arith.constant 0 : index
    %c0_4 = arith.constant 0 : index
    %3 = vector.load %arg3[%c0_3, %c0_4] : memref<1x4xf32, #tpu.memory_space<vmem>>, vector<1x4xf32>
    %4 = vector.broadcast %3 : vector<1x4xf32> to vector<16x4xf32>
    %5 = arith.addf %2, %4 : vector<16x4xf32>
    %cst_5 = arith.constant 0xFF800000 : f32
    %6 = vector.broadcast %cst_5 : f32 to vector<16x1xf32>
    %7 = vector.extract_strided_slice %5 {offsets = [0, 0], sizes = [16, 1], strides = [1, 1]} : vector<16x4xf32> to vector<16x1xf32>
    %8 = vector.broadcast %7 : vector<16x1xf32> to vector<16x4xf32>
    %9 = arith.cmpf oge, %5, %8 : vector<16x4xf32>
    %cst_6 = arith.constant 1.000000e+00 : f32
    %cst_7 = arith.constant 0.000000e+00 : f32
    %10 = vector.broadcast %cst_6 : f32 to vector<16x4xf32>
    %11 = vector.broadcast %cst_7 : f32 to vector<16x4xf32>
    %12 = arith.select %9, %10, %11 : vector<16x4xi1>, vector<16x4xf32>
    %cst_8 = arith.constant dense<0.000000e+00> : vector<16xf32>
    %13 = vector.multi_reduction <add>, %12, %cst_8 [1] : vector<16x4xf32> to vector<16xf32>
    %14 = vector.shape_cast %13 : vector<16xf32> to vector<16x1xf32>
    %cst_9 = arith.constant 2.000000e+00 : f32
    %15 = vector.broadcast %cst_9 : f32 to vector<16x1xf32>
    %16 = arith.cmpf oge, %14, %15 : vector<16x1xf32>
    %cst_10 = arith.constant 0xFF800000 : f32
    %17 = vector.broadcast %cst_10 : f32 to vector<16x1xf32>
    %18 = arith.select %16, %7, %17 : vector<16x1xi1>, vector<16x1xf32>
    %19 = arith.maximumf %6, %18 : vector<16x1xf32>
    %20 = vector.extract_strided_slice %5 {offsets = [0, 1], sizes = [16, 1], strides = [1, 1]} : vector<16x4xf32> to vector<16x1xf32>
    %21 = vector.broadcast %20 : vector<16x1xf32> to vector<16x4xf32>
    %22 = arith.cmpf oge, %5, %21 : vector<16x4xf32>
    %cst_11 = arith.constant 1.000000e+00 : f32
    %cst_12 = arith.constant 0.000000e+00 : f32
    %23 = vector.broadcast %cst_11 : f32 to vector<16x4xf32>
    %24 = vector.broadcast %cst_12 : f32 to vector<16x4xf32>
    %25 = arith.select %22, %23, %24 : vector<16x4xi1>, vector<16x4xf32>
    %cst_13 = arith.constant dense<0.000000e+00> : vector<16xf32>
    %26 = vector.multi_reduction <add>, %25, %cst_13 [1] : vector<16x4xf32> to vector<16xf32>
    %27 = vector.shape_cast %26 : vector<16xf32> to vector<16x1xf32>
    %cst_14 = arith.constant 2.000000e+00 : f32
    %28 = vector.broadcast %cst_14 : f32 to vector<16x1xf32>
    %29 = arith.cmpf oge, %27, %28 : vector<16x1xf32>
    %cst_15 = arith.constant 0xFF800000 : f32
    %30 = vector.broadcast %cst_15 : f32 to vector<16x1xf32>
    %31 = arith.select %29, %20, %30 : vector<16x1xi1>, vector<16x1xf32>
    %32 = arith.maximumf %19, %31 : vector<16x1xf32>
    %33 = vector.extract_strided_slice %5 {offsets = [0, 2], sizes = [16, 1], strides = [1, 1]} : vector<16x4xf32> to vector<16x1xf32>
    %34 = vector.broadcast %33 : vector<16x1xf32> to vector<16x4xf32>
    %35 = arith.cmpf oge, %5, %34 : vector<16x4xf32>
    %cst_16 = arith.constant 1.000000e+00 : f32
    %cst_17 = arith.constant 0.000000e+00 : f32
    %36 = vector.broadcast %cst_16 : f32 to vector<16x4xf32>
    %37 = vector.broadcast %cst_17 : f32 to vector<16x4xf32>
    %38 = arith.select %35, %36, %37 : vector<16x4xi1>, vector<16x4xf32>
    %cst_18 = arith.constant dense<0.000000e+00> : vector<16xf32>
    %39 = vector.multi_reduction <add>, %38, %cst_18 [1] : vector<16x4xf32> to vector<16xf32>
    %40 = vector.shape_cast %39 : vector<16xf32> to vector<16x1xf32>
    %cst_19 = arith.constant 2.000000e+00 : f32
    %41 = vector.broadcast %cst_19 : f32 to vector<16x1xf32>
    %42 = arith.cmpf oge, %40, %41 : vector<16x1xf32>
    %cst_20 = arith.constant 0xFF800000 : f32
    %43 = vector.broadcast %cst_20 : f32 to vector<16x1xf32>
    %44 = arith.select %42, %33, %43 : vector<16x1xi1>, vector<16x1xf32>
    %45 = arith.maximumf %32, %44 : vector<16x1xf32>
    %46 = vector.extract_strided_slice %5 {offsets = [0, 3], sizes = [16, 1], strides = [1, 1]} : vector<16x4xf32> to vector<16x1xf32>
    %47 = vector.broadcast %46 : vector<16x1xf32> to vector<16x4xf32>
    %48 = arith.cmpf oge, %5, %47 : vector<16x4xf32>
    %cst_21 = arith.constant 1.000000e+00 : f32
    %cst_22 = arith.constant 0.000000e+00 : f32
    %49 = vector.broadcast %cst_21 : f32 to vector<16x4xf32>
    %50 = vector.broadcast %cst_22 : f32 to vector<16x4xf32>
    %51 = arith.select %48, %49, %50 : vector<16x4xi1>, vector<16x4xf32>
    %cst_23 = arith.constant dense<0.000000e+00> : vector<16xf32>
    %52 = vector.multi_reduction <add>, %51, %cst_23 [1] : vector<16x4xf32> to vector<16xf32>
    %53 = vector.shape_cast %52 : vector<16xf32> to vector<16x1xf32>
    %cst_24 = arith.constant 2.000000e+00 : f32
    %54 = vector.broadcast %cst_24 : f32 to vector<16x1xf32>
    %55 = arith.cmpf oge, %53, %54 : vector<16x1xf32>
    %cst_25 = arith.constant 0xFF800000 : f32
    %56 = vector.broadcast %cst_25 : f32 to vector<16x1xf32>
    %57 = arith.select %55, %46, %56 : vector<16x1xi1>, vector<16x1xf32>
    %58 = arith.maximumf %45, %57 : vector<16x1xf32>
    %59 = vector.broadcast %58 : vector<16x1xf32> to vector<16x4xf32>
    %60 = arith.cmpf oge, %5, %59 : vector<16x4xf32>
    %cst_26 = arith.constant 0xFF800000 : f32
    %61 = vector.broadcast %cst_26 : f32 to vector<16x4xf32>
    %62 = arith.select %60, %5, %61 : vector<16x4xi1>, vector<16x4xf32>
    %cst_27 = arith.constant dense<0xFF800000> : vector<16xf32>
    %63 = vector.multi_reduction <maximumf>, %62, %cst_27 [1] : vector<16x4xf32> to vector<16xf32>
    %64 = vector.shape_cast %63 : vector<16xf32> to vector<16x1xf32>
    %65 = vector.broadcast %64 : vector<16x1xf32> to vector<16x4xf32>
    %66 = arith.subf %62, %65 : vector<16x4xf32>
    %67 = math.exp %66 : vector<16x4xf32>
    %cst_28 = arith.constant dense<0.000000e+00> : vector<16xf32>
    %68 = vector.multi_reduction <add>, %67, %cst_28 [1] : vector<16x4xf32> to vector<16xf32>
    %69 = vector.shape_cast %68 : vector<16xf32> to vector<16x1xf32>
    %70 = tpu.reciprocal %69 {approx = true} : vector<16x1xf32> -> vector<16x1xf32>
    %71 = vector.broadcast %70 : vector<16x1xf32> to vector<16x4xf32>
    %72 = arith.mulf %67, %71 : vector<16x4xf32>
    %c0_29 = arith.constant 0 : index
    %c0_30 = arith.constant 0 : index
    %73 = vector.load %arg4[%c0_29, %c0_30] : memref<16x4xf32, #tpu.memory_space<vmem>>, vector<16x4xf32>
    tpu.vector_store %arg4[%c0_29, %c0_30], %72 {strides = array<i32>} : memref<16x4xf32, #tpu.memory_space<vmem>>, vector<16x4xf32>,
    return
  }
  func.func @transform_0(%arg0: i32) -> (i32, i32) {
    %c0_i32 = arith.constant 0 : i32
    %c0_i32_0 = arith.constant 0 : i32
    return %arg0, %c0_i32 : i32, i32
  }
  func.func @transform_1(%arg0: i32) -> (i32, i32) {
    %c0_i32 = arith.constant 0 : i32
    %c0_i32_0 = arith.constant 0 : i32
    %c0_i32_1 = arith.constant 0 : i32
    return %c0_i32, %c0_i32_0 : i32, i32
  }
  func.func @transform_2(%arg0: i32) -> (i32, i32) {
    %c0_i32 = arith.constant 0 : i32
    %c0_i32_0 = arith.constant 0 : i32
    %c0_i32_1 = arith.constant 0 : i32
    return %c0_i32, %c0_i32_0 : i32, i32
  }
  func.func @transform_3(%arg0: i32) -> (i32, i32) {
    %c0_i32 = arith.constant 0 : i32
    %c0_i32_0 = arith.constant 0 : i32
    return %arg0, %c0_i32 : i32, i32
  }
}

</mosaic_0001>

<bundles_post_ra>
// kernel: tpu_custom_call.1
= control target key start
LH: loop header
LB: loop body
LE: loop exit
PB: predicated region body
PF: predicated region fallthrough
CT: control target
= control target key end

     0   :  { %vm24_vm0 = vcmask 261120   ;;  %v245_v6 = vmov 3   ;;  %v246_v7 = vmov 2   ;;  %v247_v8 = vmov 1   ;;  %s252_s25 = smov 125   ;;  %s346_s1 = inlined_call_operand.vmem [shape: f32[32,4], index: 1, kind: input, shape index: {}]   ;;  %s347_s2 = inlined_call_operand.vmem [shape: f32[1,4], index: 2, kind: input, shape index: {}]   ;;  %s348_s0 = inlined_call_operand.vmem [shape: f32[16,32], index: 0, kind: input, shape index: {}]   ;;  %s349_s3 = inlined_call_operand.vmem [shape: f32[16,4], index: 3, kind: output, shape index: {}]  }
   0x1   :  { %v19_v0 = vld [vmem:[%s346_s1 + $0x18] sm:$0xff]  ;;  %v18_v1 = vld [vmem:[%s346_s1 + $0x10] sm:$0xff]  ;;  %v17_v2 = vld [vmem:[%s346_s1 + $0x8] sm:$0xff]  ;;  %233 = vset.pattern.permute.xlu2 %v245_v6  ;;  %232 = vset.pattern.permute.xlu1 %v246_v7  ;;  %v248_v14 = vmov 0   ;;  %vm68_vm3 = vcmask 31744   ;;  %v249_v18 = vmov 0.0  }
   0x2   :  { %43 = vmatpush.msra.mxu0 %v19_v0  ;;  %219 = vmatpush.msra.mxu1 %v19_v0  ;;  %v16_v3 = vld [vmem:[%s346_s1] sm:$0xff]  ;;  %v15_v5 = vld [vmem:[%s348_s0 + $0x8] sm:$0xff] }
   0x3   :  { %v14_v4 = vld [vmem:[%s348_s0] sm:$0xff]  ;;  %231 = vset.pattern.permute.xlu0 %v247_v8  ;;  %s250_s0 = smov 126  }
   0x4   :  { %44 = vmatpush.msra.mxu0 %v18_v1  ;;  %220 = vmatpush.msra.mxu1 %v18_v1  ;;  %v236_v9 = vld [vmem:[%s347_s2] ss:$0 sm:$0xff]  ;;  %s251_s2 = smov 127  }
   0x6   :  { %45 = vmatpush.msra.mxu0 %v17_v2  ;;  %221 = vmatpush.msra.mxu1 %v17_v2 }
   0x8   :  { %46 = vmatpush.msra.mxu0 %v16_v3  ;;  %222 = vmatpush.msra.mxu1 %v16_v3 }
   0x9   :  { %217 = vmatmul.msk.f32.vlgmr.msra.gmra.mxu0 %vm24_vm0, %v14_v4  ;;  %218 = vmatmul.msk.f32.vlgmr.msra.gmra.mxu1 %vm24_vm0, %v15_v5 }
  0x86   :  { %v48_v10 = vpop.f32.mrf.mxu0  ;;  %v51_v12 = vpop.f32.mrf.mxu1 }
  0x87   :  { %v294_v11 = vadd.f32 %v236_v9, %v48_v10  ;;  %v299_v13 = vadd.f32 %v236_v9, %v51_v12 }
  0x89   :  { %144 = vperm.xlu2 %233, %v294_v11   ;;  %112 = vperm.xlu1 %232, %v294_v11  }
  0x8a   :  { %80 = vperm.xlu0 %231, %v294_v11  }
  0x91   :  { %148 = vperm.xlu2 %233, %v299_v13   ;;  %116 = vperm.xlu1 %232, %v299_v13  }
  0x92   :  { %84 = vperm.xlu0 %231, %v299_v13  }
  0x99   :  { %235 = vset.pattern.permute.xlu1 %v248_v14 }
  0x9a   :  { %234 = vset.pattern.permute.xlu0 %v248_v14  ;;  %61 = vperm.xlu1 %235, %v299_v13  }
  0x9b   :  { %56 = vperm.xlu0 %234, %v294_v11  }
  0xe3   :  { %v145_v16 = vpop.permute.xlu2 %144 }
  0xe4   :  { %vm151_vm6 = vcmp.ge.f32.partialorder %v294_v11, %v145_v16 }
  0xe5   :  { %v153_v31 = vsel %vm151_vm6, 1.0, %v249_v18 }
  0xe6   :  { %v155_v35 = vsel %vm68_vm3, %v153_v31, 0.0 }
  0xeb   :  { %v149_v26 = vpop.permute.xlu2 %148 }
  0xec   :  { %vm152_vm7 = vcmp.ge.f32.partialorder %v299_v13, %v149_v26 }
  0xed   :  { %v154_v32 = vsel %vm152_vm7, 1.0, %v249_v18 }
  0xee   :  { %v158_v36 = vsel %vm68_vm3, %v154_v32, 0.0 }
  0xfb   :  { %v113_v15 = vpop.permute.xlu1 %112 }
  0xfc   :  { %vm119_vm1 = vcmp.ge.f32.partialorder %v294_v11, %v113_v15  ;;  %v81_v17 = vpop.permute.xlu0 %80 }
  0xfd   :  { %vm87_vm2 = vcmp.ge.f32.partialorder %v294_v11, %v81_v17  ;;  %v121_v19 = vsel %vm119_vm1, 1.0, %v249_v18 }
  0xfe   :  { %v123_v20 = vsel %vm68_vm3, %v121_v19, 0.0  ;;  %v89_v21 = vsel %vm87_vm2, 1.0, %v249_v18 }
  0xff   :  { %124 = vadd.xlane.f32.xlu0 %v123_v20  ;;  %v91_v22 = vsel %vm68_vm3, %v89_v21, 0.0 }
 0x100   :  { %92 = vadd.xlane.f32.xlu2 %v91_v22 }
 0x103   :  { %v117_v23 = vpop.permute.xlu1 %116 }
 0x104   :  { %vm120_vm4 = vcmp.ge.f32.partialorder %v299_v13, %v117_v23  ;;  %v85_v24 = vpop.permute.xlu0 %84 }
 0x105   :  { %vm88_vm5 = vcmp.ge.f32.partialorder %v299_v13, %v85_v24  ;;  %v122_v25 = vsel %vm120_vm4, 1.0, %v249_v18 }
 0x106   :  { %v126_v27 = vsel %vm68_vm3, %v122_v25, 0.0  ;;  %v90_v28 = vsel %vm88_vm5, 1.0, %v249_v18 }
 0x107   :  { %v94_v29 = vsel %vm68_vm3, %v90_v28, 0.0 }
 0x108   :  { %127 = vadd.xlane.f32.xlu2 %v126_v27  ;;  %95 = vadd.xlane.f32.xlu1 %v94_v29 }
 0x10c   :  { %v62_v30 = vpop.permute.xlu1 %61 }
 0x10d   :  { %vm65_vm8 = vcmp.ge.f32.partialorder %v299_v13, %v62_v30  ;;  %v57_v33 = vpop.permute.xlu0 %56 }
 0x10e   :  { %v67_v34 = vsel %vm65_vm8, 1.0, %v249_v18  ;;  %vm64_vm9 = vcmp.ge.f32.partialorder %v294_v11, %v57_v33 }
 0x10f   :  { %v72_v37 = vsel %vm68_vm3, %v67_v34, 0.0  ;;  %v66_v38 = vsel %vm64_vm9, 1.0, %v249_v18 }
 0x110   :  { %156 = vadd.xlane.f32.xlu2 %v155_v35  ;;  %159 = vadd.xlane.f32.xlu1 %v158_v36  ;;  %v69_v39 = vsel %vm68_vm3, %v66_v38, 0.0 }
 0x111   :  { %73 = vadd.xlane.f32.xlu0 %v72_v37 }
 0x118   :  { %70 = vadd.xlane.f32.xlu2 %v69_v39 }
 0x172   :  { %v125_v40 = vpop.xlane.xlu0 %124 }
 0x173   :  { %v93_v41 = vpop.xlane.xlu2 %92  ;;  %vm129_vm10 = vcmp.ge.f32.partialorder %v125_v40, 2.0 }
 0x174   :  { %vm97_vm11 = vcmp.ge.f32.partialorder %v93_v41, 2.0  ;;  %v131_v42 = vsel %vm129_vm10, %v294_v11, -inf }
 0x175   :  { %v99_v43 = vsel %vm97_vm11, %v294_v11, -inf  ;;  %135 = vrot.lane.b32.xlu0 %v131_v42, %s250_s0 }
 0x176   :  { %103 = vrot.lane.b32.xlu1 %v99_v43, %s251_s2 }
 0x17b   :  { %v128_v44 = vpop.xlane.xlu2 %127  ;;  %v96_v45 = vpop.xlane.xlu1 %95 }
 0x17c   :  { %vm130_vm12 = vcmp.ge.f32.partialorder %v128_v44, 2.0  ;;  %vm98_vm13 = vcmp.ge.f32.partialorder %v96_v45, 2.0 }
 0x17d   :  { %v132_v46 = vsel %vm130_vm12, %v299_v13, -inf  ;;  %v100_v47 = vsel %vm98_vm13, %v299_v13, -inf }
 0x17e   :  { %137 = vrot.lane.b32.xlu1 %v132_v46, %s250_s0  ;;  %105 = vrot.lane.b32.xlu2 %v100_v47, %s251_s2 }
 0x183   :  { %v157_v48 = vpop.xlane.xlu2 %156  ;;  %v160_v49 = vpop.xlane.xlu1 %159 }
 0x184   :  { %vm161_vm14 = vcmp.ge.f32.partialorder %v157_v48, 2.0  ;;  %vm162_vm15 = vcmp.ge.f32.partialorder %v160_v49, 2.0  ;;  %v74_v53 = vpop.xlane.xlu0 %73 }
 0x185   :  { %v163_v50 = vsel %vm161_vm14, %v294_v11, -inf  ;;  %v164_v51 = vsel %vm162_vm15, %v299_v13, -inf  ;;  %vm76_vm0 = vcmp.ge.f32.partialorder %v74_v53, 2.0 }
 0x186   :  { %169 = vrot.lane.b32.xlu2 %v164_v51, %s252_s25  ;;  %167 = vrot.lane.b32.xlu0 %v163_v50, %s252_s25  ;;  %v78_v56 = vsel %vm76_vm0, %v299_v13, -inf }
 0x18b   :  { %v71_v52 = vpop.xlane.xlu2 %70 }
 0x18c   :  { %vm75_vm1 = vcmp.ge.f32.partialorder %v71_v52, 2.0 }
 0x18d   :  { %v77_v62 = vsel %vm75_vm1, %v294_v11, -inf }
 0x1d8   :  { %v106_v54 = vpop.permute.xlu2 %105 }
 0x1d9   :  { %v110_v57 = vmax.f32 %v78_v56, %v106_v54 }
 0x1e0   :  { %v170_v61 = vpop.permute.xlu2 %169 }
 0x1e7   :  { %v136_v58 = vpop.permute.xlu0 %135 }
 0x1e8   :  { %v104_v55 = vpop.permute.xlu1 %103 }
 0x1e9   :  { %v109_v63 = vmax.f32 %v77_v62, %v104_v55 }
 0x1eb   :  { %v141_v1 = vmax.f32 %v109_v63, %v136_v58 }
 0x1f0   :  { %v138_v59 = vpop.permute.xlu1 %137 }
 0x1f1   :  { %v142_v60 = vmax.f32 %v110_v57, %v138_v59 }
 0x1f3   :  { %v174_v0 = vmax.f32 %v142_v60, %v170_v61 }
 0x1f5   :  { %182 = vperm.xlu0 %234, %v174_v0  }
 0x1f8   :  { %v168_v2 = vpop.permute.xlu0 %167 }
 0x1f9   :  { %v173_v3 = vmax.f32 %v141_v1, %v168_v2 }
 0x1fb   :  { %177 = vperm.xlu1 %235, %v173_v3  }
 0x267   :  { %v183_v4 = vpop.permute.xlu0 %182 }
 0x268   :  { %vm186_vm2 = vcmp.ge.f32.partialorder %v299_v13, %v183_v4 }
 0x269   :  { %v188_v5 = vsel %vm186_vm2, %v299_v13, -inf }
 0x26a   :  { %v192_v6 = vsel %vm68_vm3, %v188_v5, -inf }
 0x26b   :  { %193 = vmax.xlane.f32.xlu1 %v192_v6 }
 0x26d   :  { %v178_v7 = vpop.permute.xlu1 %177 }
 0x26e   :  { %vm185_vm4 = vcmp.ge.f32.partialorder %v294_v11, %v178_v7 }
 0x26f   :  { %v187_v8 = vsel %vm185_vm4, %v294_v11, -inf }
 0x270   :  { %v189_v9 = vsel %vm68_vm3, %v187_v8, -inf }
 0x271   :  { %190 = vmax.xlane.f32.xlu2 %v189_v9 }
 0x2de   :  { %v194_v10 = vpop.xlane.xlu1 %193 }
 0x2df   :  { %v196_v12 = vsub.f32 %v188_v5, %v194_v10 }
 0x2e1   :  { %v199_v14 = vmul.f32 1.442695, %v196_v12 }
 0x2e3   :  { %237 = vpow2.f32 %v199_v14 }
 0x2e4   :  { %v191_v15 = vpop.xlane.xlu2 %190 }
 0x2e5   :  { %v195_v16 = vsub.f32 %v187_v8, %v191_v15 }
 0x2e7   :  { %v197_v17 = vmul.f32 1.442695, %v195_v16 }
 0x2e9   :  { %v238_v18 = vpop.eup %237  ;;  %239 = vpow2.f32 %v197_v17 }
 0x2ea   :  { %v204_v13 = vsel %vm68_vm3, %v238_v18, 0.0 }
 0x2eb   :  { %205 = vadd.xlane.f32.xlu2 %v204_v13 }
 0x2ef   :  { %v240_v19 = vpop.eup %239 }
 0x2f0   :  { %v201_v20 = vsel %vm68_vm3, %v240_v19, 0.0 }
 0x2f1   :  { %202 = vadd.xlane.f32.xlu0 %v201_v20 }
 0x35e   :  { %v206_v11 = vpop.xlane.xlu2 %205 }
 0x35f   :  { %241 = vrcp.f32 %v206_v11 }
 0x364   :  { %v203_v21 = vpop.xlane.xlu0 %202 }
 0x365   :  { %v242_v22 = vpop.eup %241  ;;  %243 = vrcp.f32 %v203_v21 }
 0x366   :  { %v210_v23 = vmul.f32 %v242_v22, %v238_v18 }
 0x368   :  { %212 = vst.msk [vmem:[%s349_s3 + $0x8] sm:$0xff] %vm68_vm3, %v210_v23 }
 0x36b   :  { %v244_v24 = vpop.eup %243 }
 0x36c   :  { %v209_v25 = vmul.f32 %v244_v24, %v240_v19 }
 0x36e   :  { %211 = vst.msk [vmem:[%s349_s3] sm:$0xff] %vm68_vm3, %v209_v25 }

</bundles_post_ra>
